<compile_context>
chip_gen: v5e
topology: v5e:2x2
jax: 0.10.0
libtpu: 0.0.40
codegen_flags: <defaults>
</compile_context>

<pallas_src>
import jax
import jax.numpy as jnp
from jax.experimental import pallas as pl
from jax.experimental.pallas import tpu as pltpu

COMPUTE_DTYPE = jnp.bfloat16


def _round_up(v, m):
    return ((v + m - 1) // m) * m


def _cdiv(a, b):
    return (a + b - 1) // b


def _dim_tiling(dim, *, max_tile, align):
    """Split `dim` into `num` equal-size tiles (multiple of `align`, capped
    near `max_tile`) minimizing padding blowup.  Idempotent on its output.

    Returns (tile, padded_dim, num) with padded_dim == tile * num >= dim.
    """
    padded = _round_up(max(dim, 1), align)
    num = _cdiv(padded, max_tile)
    tile = _round_up(_cdiv(padded, num), align)
    return tile, tile * num, num


def _decoder_kernel(x_ref, wt_ref, b_ref, o_ref):
    """One (tm, tn) f32 output tile of x @ W^T + b, accumulated over k.

    x_ref:  (tm, tk) bf16 activation tile
    wt_ref: (tk, tn) bf16 pre-transposed weight tile (W^T layout)
    b_ref:  (1, tn)  f32 bias tile (fetched per j only)
    o_ref:  (tm, tn) f32 output tile; block index constant across k, so it is
            VMEM-resident and doubles as the accumulator (no scratch needed).
    """
    @pl.when(pl.program_id(2) == 0)
    def _():
        # Seed the accumulator with the bias -> no separate epilogue add.
        o_ref[...] = jnp.broadcast_to(b_ref[...], o_ref.shape)

    o_ref[...] += jnp.dot(x_ref[...], wt_ref[...],
                          preferred_element_type=jnp.float32)


def prepare_decoder_params(weight, bias, *, max_tn=1024, max_tk=1024,
                           compute_dtype=COMPUTE_DTYPE):
    """One-time parameter preparation (call at model init, NOT per forward).

    Pads weight/bias to tile multiples, pre-transposes the weight to (K, N)
    so the kernel's dot contracts ((1,),(0,)) with no per-tile transpose,
    and casts the weight to the bf16 matmul dtype.  Bias stays f32.
    """
    output_dim, latent_dim = weight.shape
    _, N, _ = _dim_tiling(output_dim, max_tile=max_tn, align=128)
    _, K, _ = _dim_tiling(latent_dim, max_tile=max_tk, align=128)
    w_p = jnp.pad(weight, ((0, N - output_dim), (0, K - latent_dim)))
    wt = jnp.transpose(w_p).astype(compute_dtype)                    # (K, N)
    b2d = jnp.pad(bias, (0, N - output_dim)).astype(jnp.float32).reshape(1, N)
    return wt, b2d


def decoder_forward(x, wt, b2d, output_dim, *, max_tm=512, max_tn=1024,
                    max_tk=1024, compute_dtype=COMPUTE_DTYPE):
    """
    Args:
        x:   (batch, latent_dim) float32 latent codes.
        wt:  (K, N) prepared weight from prepare_decoder_params (W^T, bf16).
        b2d: (1, N) prepared f32 bias.
        output_dim: logical (unpadded) output dimension.
    Returns:
        (batch, output_dim) float32  ==  x @ weight.T + bias
    """
    batch, latent_dim = x.shape
    K, N = wt.shape
    assert K >= latent_dim and N >= output_dim

    # bf16 packs 2 rows per sublane -> keep tm a multiple of 16.
    m_align = 16 if compute_dtype == jnp.bfloat16 else 8
    tm, M, num_i = _dim_tiling(batch, max_tile=max_tm, align=m_align)

    # Re-derive K/N tilings from the prepared (already padded) shapes;
    # _dim_tiling is idempotent on its own output so they match the prep.
    tk, K2, num_k = _dim_tiling(K, max_tile=max_tk, align=128)
    tn, N2, num_j = _dim_tiling(N, max_tile=max_tn, align=128)
    assert K2 == K and N2 == N, "params must come from prepare_decoder_params"

    # v7x has 2 TensorCores: make sure at least one 'parallel' grid axis has
    # extent >= 2 when the output is wide enough to split lane-densely.
    if num_i * num_j == 1 and N % 256 == 0 and N >= 256:
        num_j, tn = 2, N // 2

    # Per-call activation prep only (cast + pad); parameters were prepared once.
    x_p = x.astype(compute_dtype)
    if (M, K) != (batch, latent_dim):
        x_p = jnp.pad(x_p, ((0, M - batch), (0, K - latent_dim)))

    # Double-buffered bf16 operand tiles + f32 output tiles, with headroom;
    # cap at 48 MiB so the budget is also safe on v7x (64 MiB physical VMEM).
    vmem_bytes = 2 * (tm * tk * 2 + tk * tn * 2 + tn * 4) + 2 * (tm * tn * 4)
    vmem_limit = min(48 * 1024 * 1024, max(32 * 1024 * 1024, 2 * vmem_bytes))

    out_padded = pl.pallas_call(
        _decoder_kernel,
        out_shape=jax.ShapeDtypeStruct((M, N), jnp.float32),
        grid_spec=pltpu.PrefetchScalarGridSpec(
            num_scalar_prefetch=0,
            grid=(num_i, num_j, num_k),
            in_specs=[
                # activation tile (tm, tk) at block (i, k)
                pl.BlockSpec((tm, tk), lambda i, j, k: (i, k)),
                # pre-transposed weight tile (tk, tn) at block (k, j)
                pl.BlockSpec((tk, tn), lambda i, j, k: (k, j)),
                # bias tile, indexed by j only (never re-fetched along k)
                pl.BlockSpec((1, tn), lambda i, j, k: (0, j)),
            ],
            out_specs=pl.BlockSpec((tm, tn), lambda i, j, k: (i, j)),
        ),
        compiler_params=pltpu.CompilerParams(
            dimension_semantics=("parallel", "parallel", "arbitrary"),
            vmem_limit_bytes=vmem_limit),
    )(x_p, wt, b2d)

    if (M, N) == (batch, output_dim):
        return out_padded
    return out_padded[:batch, :output_dim]


if __name__ == "__main__":
    # Small shapes consistent with Decoder.forward: x is (batch, latent_dim).
    batch, latent_dim, output_dim = 2, 32, 64

    key = jax.random.PRNGKey(0)
    kx, kw, kb = jax.random.split(key, 3)

    x = jax.random.normal(kx, (batch, latent_dim), dtype=jnp.float32)
    # Deterministic parameter init (mimics nn.Linear's uniform 1/sqrt(fan_in)).
    bound = 1.0 / (latent_dim ** 0.5)
    weight = jax.random.uniform(kw, (output_dim, latent_dim),
                                minval=-bound, maxval=bound, dtype=jnp.float32)
    bias = jax.random.uniform(kb, (output_dim,),
                              minval=-bound, maxval=bound, dtype=jnp.float32)

    # Parameter prep happens ONCE (model init), not per forward call.
    wt, b2d = prepare_decoder_params(weight, bias)
    out = decoder_forward(x, wt, b2d, output_dim)
    out = jax.block_until_ready(out)

    # Cross-check against plain JAX f32 reference (bf16 matmul -> relaxed tol).
    ref = x @ weight.T + bias
    assert out.shape == (batch, output_dim)
    assert jnp.allclose(out, ref, atol=2e-2, rtol=2e-2), \
        float(jnp.max(jnp.abs(out - ref)))

    print("KERNEL_OK")
</pallas_src>

<mosaic_0001>
module attributes {stable_mosaic.version = 11 : i64} {
  func.func @_decoder_kernel(%arg0: i32, %arg1: i32, %arg2: i32, %arg3: memref<16x128xbf16, #tpu.memory_space<vmem>>, %arg4: memref<128x128xbf16, #tpu.memory_space<vmem>>, %arg5: memref<1x128xf32, #tpu.memory_space<vmem>>, %arg6: memref<16x128xf32, #tpu.memory_space<vmem>>) attributes {dimension_semantics = [#tpu.dimension_semantics<parallel>, #tpu.dimension_semantics<parallel>, #tpu.dimension_semantics<arbitrary>], iteration_bounds = array<i64: 1, 1, 1>, scalar_prefetch = 0 : i64, scratch_operands = 0 : i64, tpu.core_type = #tpu.core_type<tc>, window_params = [{transform_indices = @transform_0, window_bounds = array<i64: 16, 128>}, {transform_indices = @transform_1, window_bounds = array<i64: 128, 128>}, {transform_indices = @transform_2, window_bounds = array<i64: 1, 128>}, {transform_indices = @transform_3, window_bounds = array<i64: 16, 128>}]} {
    %c0_i32 = arith.constant 0 : i32
    %0 = arith.cmpi eq, %arg2, %c0_i32 : i32
    %1 = arith.extui %0 : i1 to i32
    %c0_i32_0 = arith.constant 0 : i32
    %2 = arith.cmpi ne, %1, %c0_i32_0 : i32
    scf.if %2 {
      %c0_8 = arith.constant 0 : index
      %c0_9 = arith.constant 0 : index
      %9 = vector.load %arg5[%c0_8, %c0_9] : memref<1x128xf32, #tpu.memory_space<vmem>>, vector<1x128xf32>
      %10 = vector.shape_cast %9 : vector<1x128xf32> to vector<1x128xf32>
      %11 = vector.broadcast %10 : vector<1x128xf32> to vector<16x128xf32>
      %c0_10 = arith.constant 0 : index
      %c0_11 = arith.constant 0 : index
      %12 = vector.load %arg6[%c0_10, %c0_11] : memref<16x128xf32, #tpu.memory_space<vmem>>, vector<16x128xf32>
      tpu.vector_store %arg6[%c0_10, %c0_11], %11 {strides = array<i32>} : memref<16x128xf32, #tpu.memory_space<vmem>>, vector<16x128xf32>,
    } else {
    }
    %c0 = arith.constant 0 : index
    %c0_1 = arith.constant 0 : index
    %3 = vector.load %arg6[%c0, %c0_1] : memref<16x128xf32, #tpu.memory_space<vmem>>, vector<16x128xf32>
    %c0_2 = arith.constant 0 : index
    %c0_3 = arith.constant 0 : index
    %4 = vector.load %arg3[%c0_2, %c0_3] : memref<16x128xbf16, #tpu.memory_space<vmem>>, vector<16x128xbf16>
    %c0_4 = arith.constant 0 : index
    %c0_5 = arith.constant 0 : index
    %5 = vector.load %arg4[%c0_4, %c0_5] : memref<128x128xbf16, #tpu.memory_space<vmem>>, vector<128x128xbf16>
    %cst = arith.constant dense<0.000000e+00> : vector<16x128xf32>
    %6 = tpu.matmul %4, %5, %cst {dimension_numbers = #tpu.dot_dimension_numbers<[1], [0], [0], [1], [0, 0, 1, 1], [], []>} : vector<16x128xbf16>, vector<128x128xbf16>, vector<16x128xf32> -> vector<16x128xf32>
    %7 = arith.addf %3, %6 : vector<16x128xf32>
    %c0_6 = arith.constant 0 : index
    %c0_7 = arith.constant 0 : index
    %8 = vector.load %arg6[%c0_6, %c0_7] : memref<16x128xf32, #tpu.memory_space<vmem>>, vector<16x128xf32>
    tpu.vector_store %arg6[%c0_6, %c0_7], %7 {strides = array<i32>} : memref<16x128xf32, #tpu.memory_space<vmem>>, vector<16x128xf32>,
    return
  }
  func.func @transform_0(%arg0: i32, %arg1: i32, %arg2: i32) -> (i32, i32) {
    %c0_i32 = arith.constant 0 : i32
    return %arg0, %arg2 : i32, i32
  }
  func.func @transform_1(%arg0: i32, %arg1: i32, %arg2: i32) -> (i32, i32) {
    %c0_i32 = arith.constant 0 : i32
    return %arg2, %arg1 : i32, i32
  }
  func.func @transform_2(%arg0: i32, %arg1: i32, %arg2: i32) -> (i32, i32) {
    %c0_i32 = arith.constant 0 : i32
    %c0_i32_0 = arith.constant 0 : i32
    return %c0_i32, %arg1 : i32, i32
  }
  func.func @transform_3(%arg0: i32, %arg1: i32, %arg2: i32) -> (i32, i32) {
    %c0_i32 = arith.constant 0 : i32
    return %arg0, %arg1 : i32, i32
  }
}

</mosaic_0001>

<bundles_post_ra>
// kernel: tpu_custom_call.1
= control target key start
LH: loop header
LB: loop body
LE: loop exit
PB: predicated region body
PF: predicated region fallthrough
CT: control target
= control target key end

     0   :  { %8 = vsyncpa [#allocation3], 0  ;;  %s339_s0 = inlined_call_operand.hbm [shape: bf16[16,128], index: 0, kind: input, shape index: {}]   ;;  %s340_s1 = inlined_call_operand.hbm [shape: bf16[128,128], index: 1, kind: input, shape index: {}]   ;;  %s341_s2 = inlined_call_operand.vmem [shape: f32[1,128], index: 2, kind: input, shape index: {}]   ;;  %s342_s3 = inlined_call_operand.hbm [shape: f32[16,128], index: 3, kind: output, shape index: {}]  }
   0x1   :  { %9 = vsyncpa [#allocation6], 0 }
   0x2   :  { %10 = vsyncpa [#allocation4], 0  ;;  %s15_s14 = sshll.u32 %s339_s0, 4  ;;  %s300_s15 = smov [#allocation2]   ;;  %s16_s14 = int_to_ptr.hbm [resolvable:$true] %s15_s14 }
   0x3   :  { %s17_s16 = sshll.u32 %s300_s15, 4  ;;  %s28_s19 = sshll.u32 %s340_s1, 4  ;;  %s18_s16 = int_to_ptr.vmem [resolvable:$true] %s17_s16  ;;  %s29_s19 = int_to_ptr.hbm [resolvable:$true] %s28_s19 }
   0x4   :  { %s301_s20 = smov 64   ;;  %s302_s21 = smov 4  }
   0x5   :  { %23 = dma.hbm_to_vmem [thread:$0]  %s16_s14, 128, %s18_s16, [#allocation3], %s301_s20, %s301_s20, %s302_s21  }
   0x6   :  { %s303_s22 = smov [#allocation5]  }
   0x7   :  { %s30_s23 = sshll.u32 %s303_s22, 4  ;;  %s31_s23 = int_to_ptr.vmem [resolvable:$true] %s30_s23 }
   0x8   :  { %36 = dma.hbm_to_vmem [thread:$0]  %s29_s19, 1024, %s31_s23, [#allocation6], %s301_s20, %s301_s20, %s302_s21  }
   0x9   :  { %294 = dma.done.wait [#allocation3], 128  }
   0xa   :  { %295 = vsyncadd [#allocation3], 4294967168 }
   0xb   :  { %296 = dma.done.wait [#allocation6], 1024  }
   0xc   :  { %297 = vsyncadd [#allocation6], 4294966272  ;;  %v213_v0 = vld [vmem:[#allocation5 + $0x38] sm:$0xff]  ;;  %v212_v1 = vld [vmem:[#allocation5 + $0x30] sm:$0xff]  ;;  %s304_s24 = smov [#allocation7]   ;;  %s155_s28 = sshll.u32 %s342_s3, 4  ;;  %s156_s28 = int_to_ptr.hbm [resolvable:$true] %s155_s28 }
   0xd   :  { %131 = vmatpush.bf16.msra.mxu0 %v213_v0  ;;  %v211_v2 = vld [vmem:[#allocation5 + $0x28] sm:$0xff]  ;;  %v210_v3 = vld [vmem:[#allocation5 + $0x20] sm:$0xff]  ;;  %v209_v4 = vld [vmem:[#allocation5 + $0x18] sm:$0xff]  ;;  %s153_s25 = sshll.u32 %s304_s24, 4  ;;  %s305_s29 = smov 128   ;;  %s154_s25 = int_to_ptr.vmem [resolvable:$true] %s153_s25 }
   0xe   :  { %v208_v5 = vld [vmem:[#allocation5 + $0x10] sm:$0xff]  ;;  %v207_v6 = vld [vmem:[#allocation5 + $0x8] sm:$0xff]  ;;  %v206_v7 = vld [vmem:[#allocation5] sm:$0xff]  ;;  %s306_s30 = smov 8  }
   0xf   :  { %v205_v8 = vld [vmem:[#allocation2] sm:$0xff] }
  0x10   :  { %v221_v9 = vld [vmem:[%s341_s2] ss:$0 sm:$0xff] }
  0x11   :  { %132 = vmatpush.bf16.msra.mxu0 %v212_v1 }
  0x15   :  { %133 = vmatpush.bf16.msra.mxu0 %v211_v2 }
  0x19   :  { %134 = vmatpush.bf16.msra.mxu0 %v210_v3 }
  0x1d   :  { %135 = vmatpush.bf16.msra.mxu0 %v209_v4 }
  0x21   :  { %136 = vmatpush.bf16.msra.mxu0 %v208_v5 }
  0x25   :  { %137 = vmatpush.bf16.msra.mxu0 %v207_v6 }
  0x29   :  { %138 = vmatpush.bf16.msra.mxu0 %v206_v7 }
  0x2c   :  { %139 = vmatmul.bf16.vlgmr.msra.gmra.mxu0 %v205_v8 }
  0xa9   :  { %v140_v10 = vpop.f32.mrf.mxu0 }
  0xaa   :  { %v145_v11 = vadd.f32 %v221_v9, %v140_v10 }
  0xac   :  { %147 = vst [vmem:[#allocation7] sm:$0xff] %v145_v11 }
  0xb1   :  { %v142_v12 = vpop.f32.mrf.mxu0 }
  0xb2   :  { %v146_v13 = vadd.f32 %v221_v9, %v142_v12 }
  0xb4   :  { %148 = vst [vmem:[#allocation7 + $0x8] sm:$0xff] %v146_v13 }
  0xb5   :  { %161 = dma.vmem_to_hbm [thread:$0]  %s154_s25, 256, %s156_s28, [#allocation4], %s305_s29, %s305_s29, %s306_s30  }
  0xb6   :  { %298 = dma.done.wait [#allocation4], 256  }
  0xb7   :  { %299 = vsyncadd [#allocation4], 4294967040 }
  0xb8   :  { %166 = vsyncpa [#allocation3], 1 }
  0xb9   :  { %167 = vsyncpa [#allocation6], 1 }
  0xba   :  { %168 = vsyncpa [#allocation4], 1 }

</bundles_post_ra>
